<compile_context>
chip_gen: v7x
topology: tpu7x:2x2x1
jax: 0.10.0
libtpu: 0.0.40
codegen_flags: <defaults>
</compile_context>

<pallas_src>
import functools

import jax
import jax.numpy as jnp
from jax.experimental import pallas as pl
from jax.experimental.pallas import tpu as pltpu


# ---------------------------------------------------------------------------
# Kernel 1: fused QKV projection  (x @ w_qkv^T + b_qkv, q-scale pre-folded).
# ---------------------------------------------------------------------------
def _qkv_proj_kernel(x_ref, w_ref, b_ref, o_ref):
    x = x_ref[0]                                   # (TM, C), compute dtype
    out = jnp.dot(x, w_ref[...], preferred_element_type=jnp.float32)   # (TM, 3C) f32
    out = out + b_ref[...]                         # (1, 3C) f32 broadcast (zeros if no bias)
    o_ref[0] = out.astype(o_ref.dtype)


# ---------------------------------------------------------------------------
# Kernel 2: attention (batched over heads) + output projection, query-tiled.
# ---------------------------------------------------------------------------
def _attn_proj_kernel(q_ref, k_ref, v_ref, wproj_ref, bproj_ref, o_ref,
                      kh_ref, vh_ref, *, num_heads, exp_dtype):
    h = num_heads
    _, tq, c = q_ref.shape
    n = k_ref.shape[1]
    dh = c // h

    # K/V head relayout (N,C) -> (H,N,Dh) cached ONCE per batch element: the qi
    # grid axis is "arbitrary" so scratch persists across all query tiles of b.
    @pl.when(pl.program_id(1) == 0)
    def _():
        kh_ref[...] = k_ref[0].reshape(n, h, dh).transpose(1, 0, 2)
        vh_ref[...] = v_ref[0].reshape(n, h, dh).transpose(1, 0, 2)

    qh = q_ref[0].reshape(tq, h, dh).transpose(1, 0, 2)    # (H, TQ, Dh), scale pre-folded
    kh = kh_ref[...]
    vh = vh_ref[...]

    # Scores on the MXU, f32 accumulation (no extra in-kernel scale: folded into Wq).
    s = jnp.einsum("hqd,hkd->hqk", qh, kh, preferred_element_type=jnp.float32)

    # Numerically-stable softmax with DEFERRED normalization.
    s = s - jnp.max(s, axis=-1, keepdims=True)                    # f32 max-subtract
    p = jnp.exp(s.astype(exp_dtype))                              # exp in bf16 on v6e/v7x
    l = jnp.sum(p.astype(jnp.float32), axis=-1, keepdims=True)    # f32 denominator (H,TQ,1)
    p = p.astype(vh.dtype)                                        # bf16 operands for P@V

    o = jnp.einsum("hqk,hkd->hqd", p, vh, preferred_element_type=jnp.float32)
    # Normalize the small (H,TQ,Dh) output instead of the (H,TQ,N) probability tile.
    o = o * pl.reciprocal(l, approx=True)                         # EUP reciprocal

    attn = o.transpose(1, 0, 2).reshape(tq, c).astype(wproj_ref.dtype)
    out = jnp.dot(attn, wproj_ref[...], preferred_element_type=jnp.float32)
    out = out + bproj_ref[...]                                    # (1, C) f32
    o_ref[0] = out.astype(o_ref.dtype)


# ---------------------------------------------------------------------------
# Host-side helpers
# ---------------------------------------------------------------------------
def _pick_tile(n, target):
    """Largest row tile <= target that divides n and is a multiple of 8."""
    t = max(min((target // 8) * 8, n), 8)
    while t > 8 and n % t:
        t -= 8
    return t


def prepare_attention_params(w_qkv, w_proj, b_proj, *, num_heads, b_qkv=None,
                             compute_dtype=jnp.bfloat16):
    """One-time weight preparation -- run OUTSIDE the per-step hot path / cache it.

    Transposes to (in, out) layout, folds 1/sqrt(Dh) into the q rows of the qkv
    weight (and q part of the qkv bias), and casts to the compute dtype.
    """
    three_c, c = w_qkv.shape
    assert three_c == 3 * c and c % num_heads == 0
    scale = float(c // num_heads) ** -0.5

    w_qkv_t = jnp.transpose(w_qkv).astype(jnp.float32)             # (C, 3C)
    w_qkv_t = w_qkv_t.at[:, :c].multiply(scale).astype(compute_dtype)

    if b_qkv is None:
        b_qkv_p = jnp.zeros((1, three_c), jnp.float32)
    else:
        b_qkv_p = b_qkv.reshape(1, three_c).astype(jnp.float32)
        b_qkv_p = b_qkv_p.at[:, :c].multiply(scale)                # scale q bias too

    w_proj_t = jnp.transpose(w_proj).astype(compute_dtype)         # (C, C)
    b_proj_p = b_proj.reshape(1, c).astype(jnp.float32)

    return dict(w_qkv_t=w_qkv_t, b_qkv=b_qkv_p, w_proj_t=w_proj_t, b_proj=b_proj_p,
                num_heads=num_heads, compute_dtype=compute_dtype)


def attention_pallas(x, params, *, tm=256, tq=256, exp_dtype=None,
                     vmem_limit_bytes=40 * 1024 * 1024):
    """x: (B, N, C); params: from prepare_attention_params().

    Defaults (tm=tq=256, 40 MiB VMEM) suit v5e/v6e and leave headroom on v7x's
    64 MiB.  Pass exp_dtype=jnp.float32 on v5e (no bf16 EUP there); for very
    long N (>=2048) shrink tq or use a flash-style KV-tiled variant (TODO).
    """
    B, N, C = x.shape
    num_heads = params["num_heads"]
    compute_dtype = params["compute_dtype"]
    head_dim = C // num_heads
    if exp_dtype is None:
        exp_dtype = compute_dtype

    assert C % 128 == 0, "C must be a multiple of 128 for lane-dense tiles"
    assert N % 8 == 0, "N must be a multiple of 8"
    tm = _pick_tile(N, tm)
    tq = _pick_tile(N, tq)
    assert N % tm == 0 and N % tq == 0

    out_dtype = x.dtype
    x_c = x.astype(compute_dtype)

    def const_spec(shape, index_map):
        # Constant-index operands: single-buffered, no wasted second VMEM buffer.
        return pl.BlockSpec(shape, index_map, pipeline_mode=pl.Buffered(1))

    # ---- kernel 1: fused qkv projection (row-tiled) ----
    qkv = pl.pallas_call(
        _qkv_proj_kernel,
        out_shape=jax.ShapeDtypeStruct((B, N, 3 * C), compute_dtype),
        grid=(B, N // tm),
        in_specs=[
            pl.BlockSpec((1, tm, C), lambda b, i: (b, i, 0)),
            const_spec((C, 3 * C), lambda b, i: (0, 0)),
            const_spec((1, 3 * C), lambda b, i: (0, 0)),
        ],
        out_specs=pl.BlockSpec((1, tm, 3 * C), lambda b, i: (b, i, 0)),
        compiler_params=pltpu.CompilerParams(
            dimension_semantics=("parallel", "parallel"),
            vmem_limit_bytes=vmem_limit_bytes),
    )(x_c, params["w_qkv_t"], params["b_qkv"])

    # ---- kernel 2: attention + output projection (query-tiled) ----
    # qi axis MUST be "arbitrary": the K/V head relayout is cached in scratch at
    # qi==0 and reused by later query tiles.  B stays "parallel" so v7x's two
    # TensorCores both get work whenever B >= 2.
    kernel = functools.partial(_attn_proj_kernel, num_heads=num_heads,
                               exp_dtype=exp_dtype)
    out = pl.pallas_call(
        kernel,
        out_shape=jax.ShapeDtypeStruct((B, N, C), out_dtype),
        grid=(B, N // tq),
        in_specs=[
            pl.BlockSpec((1, tq, C), lambda b, qi: (b, qi, 0)),   # Q tile (cols 0:C)
            const_spec((1, N, C), lambda b, qi: (b, 0, 1)),       # full K (cols C:2C)
            const_spec((1, N, C), lambda b, qi: (b, 0, 2)),       # full V (cols 2C:3C)
            const_spec((C, C), lambda b, qi: (0, 0)),             # proj weight (pre-T)
            const_spec((1, C), lambda b, qi: (0, 0)),             # proj bias (f32)
        ],
        out_specs=pl.BlockSpec((1, tq, C), lambda b, qi: (b, qi, 0)),
        scratch_shapes=[
            pltpu.VMEM((num_heads, N, head_dim), compute_dtype),  # cached K heads
            pltpu.VMEM((num_heads, N, head_dim), compute_dtype),  # cached V heads
        ],
        compiler_params=pltpu.CompilerParams(
            dimension_semantics=("parallel", "arbitrary"),
            vmem_limit_bytes=vmem_limit_bytes),
    )(qkv, qkv, qkv, params["w_proj_t"], params["b_proj"])

    return out


# ---------------------------------------------------------------------------
# Plain-JAX reference mirroring the PyTorch forward (eval mode).
# ---------------------------------------------------------------------------
def attention_reference(x, w_qkv, w_proj, b_proj, *, num_heads, b_qkv=None):
    B, N, C = x.shape
    Dh = C // num_heads
    scale = float(Dh) ** -0.5

    qkv = jnp.einsum("bnc,oc->bno", x, w_qkv)                    # (B, N, 3C)
    if b_qkv is not None:
        qkv = qkv + b_qkv.reshape(1, 1, 3 * C)
    qkv = qkv.reshape(B, N, 3, num_heads, Dh).transpose(2, 0, 3, 1, 4)
    q, k, v = qkv[0], qkv[1], qkv[2]                             # (B, H, N, Dh)

    s = jnp.einsum("bhnd,bhmd->bhnm", q, k) * scale
    p = jax.nn.softmax(s, axis=-1)
    o = jnp.einsum("bhnm,bhmd->bhnd", p, v)                      # (B, H, N, Dh)
    o = o.transpose(0, 2, 1, 3).reshape(B, N, C)
    return jnp.einsum("bnc,oc->bno", o, w_proj) + b_proj.reshape(1, 1, C)


if __name__ == "__main__":
    # Small, lane-dense shapes: B=2, N=16 tokens, dim=128, 8 heads (Dh=16).
    B, N, C = 2, 16, 128
    num_heads = 8

    key = jax.random.PRNGKey(0)
    kx, kw1, kw2, kb, kbq = jax.random.split(key, 5)

    x = jax.random.normal(kx, (B, N, C), dtype=jnp.float32)
    # Deterministic synthetic parameters (nn.Linear shapes: (out_features, in_features)).
    w_qkv = jax.random.normal(kw1, (3 * C, C), dtype=jnp.float32) * 0.05
    w_proj = jax.random.normal(kw2, (C, C), dtype=jnp.float32) * 0.05
    b_proj = jax.random.normal(kb, (1, C), dtype=jnp.float32) * 0.01
    b_qkv = jax.random.normal(kbq, (3 * C,), dtype=jnp.float32) * 0.01

    def _rt(a):  # round-trip through bf16 so the reference sees the same operands
        return a.astype(jnp.bfloat16).astype(jnp.float32)

    # --- bf16 path, qkv_bias=True (DiTBlock config), small tiles so several query
    #     tiles per batch element exercise the qi==0 K/V-relayout caching. ---
    params_bf16 = prepare_attention_params(w_qkv, w_proj, b_proj, b_qkv=b_qkv,
                                           num_heads=num_heads,
                                           compute_dtype=jnp.bfloat16)
    out_bf16 = jax.block_until_ready(attention_pallas(x, params_bf16, tm=8, tq=8))
    ref_bf16 = attention_reference(_rt(x), _rt(w_qkv), _rt(w_proj), b_proj,
                                   num_heads=num_heads, b_qkv=b_qkv)
    assert out_bf16.shape == (B, N, C)
    assert jnp.allclose(out_bf16, ref_bf16, atol=5e-2, rtol=5e-2), \
        "bf16-path mismatch vs reference"

    # --- f32 compute path, default (full-N) tiles, no qkv bias (timm default). ---
    params_f32 = prepare_attention_params(w_qkv, w_proj, b_proj,
                                          num_heads=num_heads,
                                          compute_dtype=jnp.float32)
    out_f32 = jax.block_until_ready(attention_pallas(x, params_f32))
    ref_f32 = attention_reference(x, w_qkv, w_proj, b_proj, num_heads=num_heads)
    assert jnp.allclose(out_f32, ref_f32, atol=2e-2, rtol=2e-2), \
        "f32-path mismatch vs reference"

    print("KERNEL_OK")
</pallas_src>

<mosaic_0001>
module attributes {stable_mosaic.version = 11 : i64} {
  func.func @_qkv_proj_kernel(%arg0: i32, %arg1: i32, %arg2: memref<1x8x128xbf16, #tpu.memory_space<vmem>>, %arg3: memref<128x384xbf16, #tpu.memory_space<vmem>>, %arg4: memref<1x384xf32, #tpu.memory_space<vmem>>, %arg5: memref<1x8x384xbf16, #tpu.memory_space<vmem>>) attributes {dimension_semantics = [#tpu.dimension_semantics<parallel>, #tpu.dimension_semantics<parallel>], iteration_bounds = array<i64: 2, 2>, scalar_prefetch = 0 : i64, scratch_operands = 0 : i64, tpu.core_type = #tpu.core_type<tc>, window_params = [{transform_indices = @transform_0, window_bounds = array<i64: 1, 8, 128>}, {pipeline_mode = #tpu.pipeline_mode<synchronous>, transform_indices = @transform_1, window_bounds = array<i64: 128, 384>}, {pipeline_mode = #tpu.pipeline_mode<synchronous>, transform_indices = @transform_2, window_bounds = array<i64: 1, 384>}, {transform_indices = @transform_3, window_bounds = array<i64: 1, 8, 384>}]} {
    %c0 = arith.constant 0 : index
    %c0_0 = arith.constant 0 : index
    %c0_1 = arith.constant 0 : index
    %0 = vector.load %arg2[%c0, %c0_0, %c0_1] : memref<1x8x128xbf16, #tpu.memory_space<vmem>>, vector<1x8x128xbf16>
    %1 = vector.shape_cast %0 : vector<1x8x128xbf16> to vector<8x128xbf16>
    %c0_2 = arith.constant 0 : index
    %c0_3 = arith.constant 0 : index
    %2 = vector.load %arg3[%c0_2, %c0_3] : memref<128x384xbf16, #tpu.memory_space<vmem>>, vector<128x384xbf16>
    %cst = arith.constant dense<0.000000e+00> : vector<8x384xf32>
    %3 = tpu.matmul %1, %2, %cst {dimension_numbers = #tpu.dot_dimension_numbers<[1], [0], [0], [1], [0, 0, 1, 1], [], []>} : vector<8x128xbf16>, vector<128x384xbf16>, vector<8x384xf32> -> vector<8x384xf32>
    %c0_4 = arith.constant 0 : index
    %c0_5 = arith.constant 0 : index
    %4 = vector.load %arg4[%c0_4, %c0_5] : memref<1x384xf32, #tpu.memory_space<vmem>>, vector<1x384xf32>
    %5 = vector.broadcast %4 : vector<1x384xf32> to vector<8x384xf32>
    %6 = arith.addf %3, %5 : vector<8x384xf32>
    %7 = arith.truncf %6 : vector<8x384xf32> to vector<8x384xbf16>
    %c0_6 = arith.constant 0 : index
    %c0_7 = arith.constant 0 : index
    %c0_8 = arith.constant 0 : index
    %8 = vector.load %arg5[%c0_6, %c0_7, %c0_8] : memref<1x8x384xbf16, #tpu.memory_space<vmem>>, vector<1x8x384xbf16>
    %9 = vector.shape_cast %8 : vector<1x8x384xbf16> to vector<8x384xbf16>
    %10 = vector.shape_cast %7 : vector<8x384xbf16> to vector<1x8x384xbf16>
    tpu.vector_store %arg5[%c0_6, %c0_7, %c0_8], %10 {strides = array<i32>} : memref<1x8x384xbf16, #tpu.memory_space<vmem>>, vector<1x8x384xbf16>,
    return
  }
  func.func @transform_0(%arg0: i32, %arg1: i32) -> (i32, i32, i32) {
    %c0_i32 = arith.constant 0 : i32
    %c0_i32_0 = arith.constant 0 : i32
    return %arg0, %arg1, %c0_i32 : i32, i32, i32
  }
  func.func @transform_1(%arg0: i32, %arg1: i32) -> (i32, i32) {
    %c0_i32 = arith.constant 0 : i32
    %c0_i32_0 = arith.constant 0 : i32
    %c0_i32_1 = arith.constant 0 : i32
    return %c0_i32, %c0_i32_0 : i32, i32
  }
  func.func @transform_2(%arg0: i32, %arg1: i32) -> (i32, i32) {
    %c0_i32 = arith.constant 0 : i32
    %c0_i32_0 = arith.constant 0 : i32
    %c0_i32_1 = arith.constant 0 : i32
    return %c0_i32, %c0_i32_0 : i32, i32
  }
  func.func @transform_3(%arg0: i32, %arg1: i32) -> (i32, i32, i32) {
    %c0_i32 = arith.constant 0 : i32
    %c0_i32_0 = arith.constant 0 : i32
    return %arg0, %arg1, %c0_i32 : i32, i32, i32
  }
}

</mosaic_0001>

<bundles_post_ra>
// kernel: tpu_custom_call.1
= control target key start
LH: loop header
LB: loop body
LE: loop exit
PB: predicated region body
PF: predicated region fallthrough
CT: control target
= control target key end

     0   :  { %s1242_s0 = inlined_call_operand.hbm [shape: bf16[2,16,128], index: 0, kind: input, shape index: {}]   ;;  %s1243_s1 = inlined_call_operand.hbm [shape: bf16[128,384], index: 1, kind: input, shape index: {}]   ;;  %s1244_s2 = inlined_call_operand.vmem [shape: f32[1,384], index: 2, kind: input, shape index: {}]   ;;  %s1245_s3 = inlined_call_operand.hbm [shape: bf16[2,16,384], index: 3, kind: output, shape index: {}]  }
   0x1   :  { %1253 = sst [smem:[#allocation14_spill]] %s1243_s1 }
   0x2   :  { %8 = vsyncpa [#allocation3], 0 }
   0x3   :  { %10 = vsyncpa [#allocation3 + $0x1], 0 }
   0x4   :  { %11 = vsyncpa [#allocation6], 0 }
   0x5   :  { %12 = vsyncpa [#allocation4], 0 }
   0x6   :  { %14 = vsyncpa [#allocation4 + $0x1], 0  ;;  %s997_s12 = smov 0   ;;  %s999_s13 = smov 0  }
   0x7   :  { %s1001_s14 = smov 0   ;;  %s1003_s15 = smov 0  }
   0x8   :  { %s1005_s16 = smov 0   ;;  %s1007_s17 = smov 0  }
   0x9   :  { %s1009_s18 = smov 0   ;;  %s1011_s19 = smov 0  }
   0xa LB: > { %1254 = sst [smem:[#allocation11_spill]] %s939_s12  ;;  %s607_s20 = sadd.s32 4294967295, %s967_s19   ;;  %s967_s19 = sphi %s1011_s19, %s20_s19   ;;  %s963_s18 = sphi %s1009_s18, %s1281_s18   ;;  %s959_s17 = sphi %s1007_s17, %s1280_s17   ;;  %s955_s16 = sphi %s1005_s16, %s1279_s16   ;;  %s951_s15 = sphi %s1003_s15, %s1278_s15   ;;  %s947_s14 = sphi %s1001_s14, %s1277_s14   ;;  %s943_s13 = sphi %s999_s13, %s1276_s13   ;;  %s939_s12 = sphi %s997_s12, %s1275_s12  }
   0xb   : > { %s608_s21 = sadd.s32 4294967294, %s967_s19   ;;  %p54_p0 = scmp.ne.s32.totalorder %s943_s13, %s939_s12 }
   0xc   : > { %p1041_p1 = scmp.eq.s32.totalorder %s607_s20, 0  ;;  %p1045_p2 = scmp.eq.s32.totalorder %s607_s20, 3 }
   0xd   : > { %p128_p3 = scmp.eq.s32.totalorder %s608_s21, 3  ;;  %p609_p5 = scmp.ge.s32.totalorder %s967_s19, 1 }
   0xe   : > { %s1255_s22 = scalar_select %p1041_p1, 1, 0 }
   0xf   : > { %s1256_s23 = scalar_select %p1045_p2, 1, 0 }
  0x10   : > { %p1051_p4 = por %p1041_p1, %p54_p0  ;;  %p1056_p6 = por %p128_p3, %p54_p0 }
  0x11   : > { %p135_p7 = scmp.lt.s32.totalorder %s967_s19, 5  ;;  %s969_s27 = smov [#allocation5]  }
  0x12   : > { %s1257_s24 = scalar_select %p1051_p4, 1, 0 }
  0x13   : > { %s1258_s25 = scalar_select %p1056_p6, 1, 0 }
  0x14   : > { %p1061_p8 = pnand %p609_p5, %p135_p7  ;;  %s147_s28 = sshll.u32 %s969_s27, 4  ;;  %s148_s28 = int_to_ptr.vmem [resolvable:$true] %s147_s28 }
  0x15   : > { %1259 = sst [smem:[#allocation12_spill]] %s1258_s25  ;;  %s1262_s1 = sld [smem:[#allocation14_spill]] }
  0x16   : > { %s1260_s26 = scalar_select %p1061_p8, 1, 0 }
  0x17   : > { %p689_p9 = pneg %p1061_p8 }
  0x19   : > { %p1069_p10 = pnand %p689_p9, %p1041_p1 }
  0x1b   : > { %s807_s5 = scalar_lea.hbm %s1262_s1, 3072  ;;  %p809_p12 = pneg %p1069_p10 }
  0x1c   : > { %p808_p11 = scmp.ne.s32.totalorder %s1262_s1, %s807_s5  ;;  %p814_p3 = scmp.lt.u32.totalorder %s807_s5, %s1262_s1 }
  0x1e   : > { %p810_p13 = pnand %p809_p12, %p808_p11 }
  0x20   : > { %p811_p0 = pneg %p810_p13 }
  0x22   : > { %p816_p5 = pnand %p814_p3, %p811_p0 }
  0x24   : > { %819 = shalt.err (!%p816_p5)
}
  0x25   : > { %s820_s10 = scalar_lea.vmem %s148_s28, 3072  ;;  %p828_p1 = scmp.lt.s32.totalorder %s148_s28, %s148_s28 }
  0x26   : > { %p821_p7 = scmp.ne.s32.totalorder %s148_s28, %s820_s10  ;;  %p829_p4 = scmp.lt.s32.totalorder %s820_s10, %s820_s10 }
  0x28   : > { %p823_p9 = pnand %p821_p7, %p809_p12  ;;  %p830_p8 = por %p829_p4, %p828_p1 }
  0x2a   : > { %p824_p6 = pneg %p823_p9 }
  0x2c   : > { %p831_p2 = pnand %p830_p8, %p824_p6 }
  0x2e   : > { %834 = shalt.err (!%p831_p2)
}
  0x2f   : > { %s970_s11 = smov 192   ;;  %s971_s20 = smov 12  }
  0x30   : > { %692 = dma.hbm_to_vmem [thread:$0]  (!%p1069_p10), %s1262_s1, 3072, %s148_s28, [#allocation6], %s970_s11, %s970_s11, %s971_s20  }
  0x31   : > { %s29_s30 = sadd.s32 1, %s959_s17  ;;  %s32_s4 = sadd.s32 1, %s963_s18 }
  0x32   : > { %p30_p1 = scmp.ge.s32.totalorder %s29_s30, 2  ;;  %s41_s5 = sadd.s32 1, %s947_s14 }
  0x33   : > { %p48_p2 = scmp.ne.s32.totalorder %s947_s14, %s943_s13  ;;  %p49_p4 = scmp.eq.s32.totalorder %s967_s19, 0 }
  0x34   : > { %s1283_s30 = smov (%p30_p1, %s29_s30), 0  ;;  %s1285_s4 = smov (!%p30_p1, %s32_s4), %s963_s18 }
  0x35   : > { %1263 = sst [smem:[#allocation13_spill]] %s1283_s30  ;;  %s37_s6 = ssub.s32 %s959_s17, %s1283_s30 }
  0x36   : > { %p34_p6 = scmp.ge.s32.totalorder %s1285_s4, 2  ;;  %p1264_p8 = scmp.ne.s32.totalorder %s1256_s23, 0 }
  0x37   : > { %p1106_p10 = por %p49_p4, %p48_p2  ;;  %p702_p12 = scmp.lt.s32.totalorder %s967_s19, 4 }
  0x38   : > { %p1102_p11 = por %p1264_p8, %p48_p2  ;;  %s1287_s4 = smov (%p34_p6, %s1285_s4), 0 }
  0x39   : > { %s164_s7 = sand.u32 1, %s947_s14   ;;  %s613_s8 = sshll.u32 %s963_s18, 1 }
  0x3a   : > { %s36_s9 = ssub.s32 %s963_s18, %s1287_s4  ;;  %s612_s11 = sshll.u32 %s164_s7, 2 }
  0x3b   : > { %s38_s10 = sor.u32 %s37_s6, %s36_s9  ;;  %s173_s23 = sadd.s32 %s959_s17, %s613_s8 }
  0x3c   : > { %p39_p13 = scmp.eq.s32.totalorder %s38_s10, 0  ;;  %s168_s20 = scalar_lea.vmem [#allocation2], %s612_s11 }
  0x3d   : > { %s177_s21 = sshll.u32 %s168_s20, 4  ;;  %s614_s1 = sshll.u32 %s173_s23, 6  ;;  %s1121_s21 = int_to_ptr.vmem [resolvable:$true] %s177_s21 }
  0x3e   : > { %s1119_s27 = scalar_select %p39_p13, %s947_s14, %s41_s5  }
  0x3f   : > { %s1126_s12 = scalar_lea.hbm %s1242_s0, %s614_s1  ;;  %p1132_p0 = pnand %p702_p12, %p1106_p10 }
  0x40   : > { %s165_s5 = scalar_lea.sflag [#allocation3], %s164_s7  ;;  %s835_s8 = scalar_lea.hbm %s1126_s12, 64 }
  0x41   : > { %p836_p3 = scmp.ne.s32.totalorder %s1126_s12, %s835_s8  ;;  %p837_p5 = pneg %p1132_p0 }
  0x42   : > { %s840_s30 = scalar_lea.hbm %s1242_s0, 256  ;;  %p841_p1 = scmp.lt.u32.totalorder %s1126_s12, %s1242_s0 }
  0x43   : > { %p838_p7 = pnand %p837_p5, %p836_p3  ;;  %p842_p2 = scmp.lt.u32.totalorder %s840_s30, %s835_s8 }
  0x44   : > { %p844_p6 = scmp.lt.u32.totalorder %s835_s8, %s1126_s12 }
  0x45   : > { %p839_p9 = pneg %p838_p7  ;;  %p843_p4 = por %p842_p2, %p841_p1 }
  0x47   : > { %p845_p8 = por %p844_p6, %p843_p4 }
  0x49   : > { %p846_p10 = pnand %p845_p8, %p839_p9 }
  0x4b   : > { %849 = shalt.err (!%p846_p10)
}
  0x4c   : > { %s850_s7 = scalar_lea.vmem %s1121_s21, 64  ;;  %s972_s10 = smov [#allocation2]  }
  0x4d   : > { %p851_p12 = scmp.ne.s32.totalorder %s1121_s21, %s850_s7  ;;  %s855_s11 = sshll.u32 %s972_s10, 4  ;;  %s856_s11 = int_to_ptr.vmem [resolvable:$false] %s855_s11 }
  0x4e   : > { %s857_s23 = scalar_lea.vmem %s856_s11, 128  ;;  %p858_p7 = scmp.lt.s32.totalorder %s1121_s21, %s856_s11 }
  0x4f   : > { %p853_p13 = pnand %p851_p12, %p837_p5  ;;  %p859_p1 = scmp.lt.s32.totalorder %s857_s23, %s850_s7 }
  0x51   : > { %p854_p3 = pneg %p853_p13  ;;  %p860_p2 = por %p859_p1, %p858_p7 }
  0x53   : > { %p861_p4 = pnand %p860_p2, %p854_p3 }
  0x55   : > { %864 = shalt.err (!%p861_p4)
}
  0x56   : > { %696 = dma.hbm_to_vmem [thread:$0]  (!%p1132_p0), %s1126_s12, 64, %s1121_s21, %s165_s5  }
  0x57   : > { %p1268_p9 = scmp.ne.s32.totalorder %s1260_s26, 0 }
  0x58   : > { %s1164_s20 = sand.u32 (!%p1268_p9), 1, %s943_s13   ;;  %p1269_p5 = scmp.ne.s32.totalorder (!%p1268_p9), %s1257_s24, 0 }
  0x59   : > { %186 = sbr.rel (%p1268_p9) target bundleno = 365 (0x16d), region = 32  ;;  %s616_s8 = sshll.u32 (!%p1268_p9), %s1164_s20, 2 }
  0x5a   : > { %s189_s1 = scalar_lea.sflag (!%p1268_p9), [#allocation3], %s1164_s20  ;;  %s1168_s25 = scalar_lea.vmem (!%p1268_p9), [#allocation2], %s616_s8 }
  0x60   : > { %926 = dma.done.wait (%p1269_p5), %s189_s1, 64  }
  0x61   : > { %928 = vsyncadd (%p1269_p5), %s189_s1, 4294967232  ;;  %p1270_p0 = scmp.ne.s32.totalorder %s1255_s22, 0 }
  0x63   : > { %930 = dma.done.wait (%p1270_p0), [#allocation6], 3072  }
  0x64   : > { %932 = vsyncadd (%p1270_p0), [#allocation6], 4294964224  ;;  %v973_v0 = vmov 0.0   ;;  %vm974_vm0 = vmmov 0   ;;  %v975_v1 = vmov 0   ;;  %v255_v27 = vlaneseq  ;;  %s678_s12 = smul.u32 12, %s1164_s20 }
  0x65   : > { %658 = vmatprep.subr.bf16.mxu1 %v973_v0  ;;  %674 = vmatprep.mubr.msk.bf16.mxu1 %vm974_vm0, %v973_v0  ;;  %v775_v2 = vld [vmem:[#allocation5 + $0x4] ss:$12 sps:$4 sm:$0xff]   ;;  %v777_v3 = vld [vmem:[#allocation5 + $0x8] ss:$12 sps:$4 sm:$0xff]   ;;  %v778_v4 = vld [vmem:[#allocation5] ss:$12 sps:$4 sm:$0xff]  }
  0x66   : > { %430 = vmatprep.mubr.bf16.mxu0 %v975_v1  ;;  %398 = vmatprep.subr.bf16.mxu0 %v775_v2  ;;  %v779_v5 = vld [vmem:[#allocation5 + $0x1c] ss:$12 sps:$4 sm:$0xff]   ;;  %v781_v6 = vld [vmem:[#allocation5 + $0x20] ss:$12 sps:$4 sm:$0xff]   ;;  %v782_v7 = vld [vmem:[#allocation5 + $0x18] ss:$12 sps:$4 sm:$0xff]  }
  0x67   : > { %659 = vmatpush3.bf16.msra.mxu1 %v777_v3  ;;  %399 = vmatpush1.bf16.msra.mxu0 %v778_v4  ;;  %v783_v8 = vld [vmem:[#allocation5 + $0x34] ss:$12 sps:$4 sm:$0xff]   ;;  %v785_v9 = vld [vmem:[#allocation5 + $0x38] ss:$12 sps:$4 sm:$0xff]   ;;  %v786_v10 = vld [vmem:[#allocation5 + $0x30] ss:$12 sps:$4 sm:$0xff]  }
  0x68   : > { %660 = vmatprep.subr.bf16.mxu1 %v973_v0  ;;  %400 = vmatprep.subr.bf16.mxu0 %v779_v5  ;;  %v787_v11 = vld [vmem:[#allocation5 + $0x4c] ss:$12 sps:$4 sm:$0xff]   ;;  %v789_v12 = vld [vmem:[#allocation5 + $0x50] ss:$12 sps:$4 sm:$0xff]   ;;  %v790_v13 = vld [vmem:[#allocation5 + $0x48] ss:$12 sps:$4 sm:$0xff]  }
  0x69   : > { %v791_v14 = vld [vmem:[#allocation5 + $0x64] ss:$12 sps:$4 sm:$0xff]   ;;  %v793_v15 = vld [vmem:[#allocation5 + $0x68] ss:$12 sps:$4 sm:$0xff]   ;;  %v794_v16 = vld [vmem:[#allocation5 + $0x60] ss:$12 sps:$4 sm:$0xff]  }
  0x6a   : > { %v795_v17 = vld [vmem:[#allocation5 + $0x7c] ss:$12 sps:$4 sm:$0xff]   ;;  %v797_v18 = vld [vmem:[#allocation5 + $0x80] ss:$12 sps:$4 sm:$0xff]   ;;  %v798_v19 = vld [vmem:[#allocation5 + $0x78] ss:$12 sps:$4 sm:$0xff]  }
  0x6b   : > { %661 = vmatpush3.bf16.msra.mxu1 %v781_v6  ;;  %401 = vmatpush1.bf16.msra.mxu0 %v782_v7  ;;  %v799_v20 = vld [vmem:[#allocation5 + $0x94] ss:$12 sps:$4 sm:$0xff]   ;;  %v801_v21 = vld [vmem:[#allocation5 + $0x98] ss:$12 sps:$4 sm:$0xff]   ;;  %v802_v22 = vld [vmem:[#allocation5 + $0x90] ss:$12 sps:$4 sm:$0xff]  }
  0x6c   : > { %662 = vmatprep.subr.bf16.mxu1 %v973_v0  ;;  %402 = vmatprep.subr.bf16.mxu0 %v783_v8  ;;  %v803_v23 = vld [vmem:[#allocation5 + $0xac] ss:$12 sps:$4 sm:$0xff]   ;;  %v805_v24 = vld [vmem:[#allocation5 + $0xb0] ss:$12 sps:$4 sm:$0xff]   ;;  %v806_v25 = vld [vmem:[#allocation5 + $0xa8] ss:$12 sps:$4 sm:$0xff]  }
  0x6d   : > { %v220_v26 = vld [vmem:[%s1168_s25] sm:$0xf]  ;;  %v256_v28 = vshrl.u32 %v255_v27, 7  ;;  %s679_s26 = smul.u32 3, %s951_s15  ;;  %s218_s30 = scalar_lea.vmem [#allocation7], %s678_s12 }
  0x6e   : > { %v253_v30 = vld [vmem:[%s1244_s2] sm:$0x7]  ;;  %s680_s21 = smul.u32 6, %s955_s16  ;;  %s511_s28 = sshll.u32 %s218_s30, 4  ;;  %s1190_s28 = int_to_ptr.vmem [resolvable:$true] %s511_s28 }
  0x6f   : > { %663 = vmatpush3.bf16.msra.mxu1 %v785_v9  ;;  %403 = vmatpush1.bf16.msra.mxu0 %v786_v10  ;;  %v265_v29 = vsub.s32 2, %v256_v28  ;;  %v257_v31 = vsub.s32 0, %v256_v28  ;;  %v261_v32 = vsub.s32 1, %v256_v28  ;;  %s495_s7 = scalar_lea.sflag [#allocation4], %s1164_s20  ;;  %s865_s10 = scalar_lea.vmem %s1190_s28, 192 }
  0x70   : > { %664 = vmatprep.subr.bf16.mxu1 %v973_v0  ;;  %404 = vmatprep.subr.bf16.mxu0 %v787_v11  ;;  %s507_s6 = sadd.s32 %s680_s21, %s679_s26  ;;  %p866_p6 = scmp.ne.s32.totalorder %s1190_s28, %s865_s10 }
  0x71   : > { %v266_v33 = vrot.slane %v253_v30, %v265_v29  ;;  %v258_v34 = vrot.slane %v253_v30, %v257_v31  ;;  %v262_v35 = vrot.slane %v253_v30, %v261_v32  ;;  %s644_s5 = sshll.u32 %s507_s6, 6  ;;  %s976_s11 = smov [#allocation7]  }
  0x72   : > { %s1188_s9 = scalar_lea.hbm %s1245_s3, %s644_s5  ;;  %p867_p8 = pnand %p866_p6, %p1102_p11 }
  0x73   : > { %665 = vmatpush3.bf16.msra.mxu1 %v789_v12  ;;  %405 = vmatpush1.bf16.msra.mxu0 %v790_v13  ;;  %s869_s23 = sshll.u32 %s976_s11, 4  ;;  %s870_s23 = int_to_ptr.vmem [resolvable:$false] %s869_s23 }
  0x74   : > { %666 = vmatprep.subr.bf16.mxu1 %v973_v0  ;;  %406 = vmatprep.subr.bf16.mxu0 %v791_v14  ;;  %p868_p10 = pneg %p867_p8  ;;  %s871_s8 = scalar_lea.vmem %s870_s23, 384 }
  0x75   : > { %p872_p12 = scmp.lt.s32.totalorder %s1190_s28, %s870_s23  ;;  %p873_p13 = scmp.lt.s32.totalorder %s871_s8, %s865_s10 }
  0x77   : > { %667 = vmatpush3.bf16.msra.mxu1 %v793_v15  ;;  %407 = vmatpush1.bf16.msra.mxu0 %v794_v16  ;;  %p874_p3 = por %p873_p13, %p872_p12 }
  0x78   : > { %668 = vmatprep.subr.bf16.mxu1 %v973_v0  ;;  %408 = vmatprep.subr.bf16.mxu0 %v795_v17 }
  0x79   : > { %p875_p7 = pnand %p874_p3, %p868_p10 }
  0x7b   : > { %669 = vmatpush3.bf16.msra.mxu1 %v797_v18  ;;  %409 = vmatpush1.bf16.msra.mxu0 %v798_v19 }
  0x7c   : > { %670 = vmatprep.subr.bf16.mxu1 %v973_v0  ;;  %410 = vmatprep.subr.bf16.mxu0 %v799_v20 }
  0x7f   : > { %671 = vmatpush3.bf16.msra.mxu1 %v801_v21  ;;  %411 = vmatpush1.bf16.msra.mxu0 %v802_v22 }
  0x80   : > { %672 = vmatprep.subr.bf16.mxu1 %v973_v0  ;;  %412 = vmatprep.subr.bf16.mxu0 %v803_v23 }
  0x83   : > { %673 = vmatpush3.bf16.msra.mxu1 %v805_v24  ;;  %413 = vmatpush1.bf16.msra.mxu0 %v806_v25 }
  0x86   : > { %675 = vmatmul.mubr.bf16.vlgmr.msra.gmra.mrb[0].mxu1 %v220_v26  ;;  %431 = vmatmul.mubr.bf16.vlgmr.msra.gmra.mrb[0].mxu0 %v220_v26 }
 0x159   : > { %v473_v36 = vpop.f32.mrb[0].mxu1  ;;  %v432_v38 = vpop.f32.mrb[0].mxu0 }
 0x15a   : > { %v474_v37 = vadd.f32 %v473_v36, %v266_v33  ;;  %v676_v39 = vpop.f32.mrb[1].mxu1  ;;  %v433_v40 = vadd.f32 %v432_v38, %v258_v34  ;;  %v434_v41 = vpop.f32.mrb[1].mxu0 }
 0x15b   : > { %v476_v42 = vpop.f32.mrb[2].mxu1  ;;  %v435_v44 = vadd.f32 %v434_v41, %v262_v35  ;;  %v436_v45 = vpop.f32.mrb[2].mxu0 }
 0x15c   : > { %v648_v43 = vpack.c.bf16 %v474_v37, %v474_v37  ;;  %v677_v46 = vpop.f32.mrb[3].mxu1  ;;  %v437_v47 = vpop.f32.mrb[3].mxu0 }
 0x15d   : > { %v647_v48 = vpack.c.bf16 %v435_v44, %v433_v40 }
 0x15e   : > { %493 = vst [vmem:[%s218_s30 + $0x8] sm:$0xf] %v648_v43 }
 0x15f   : > { %492 = vst [vmem:[%s218_s30] sm:$0xff] %v647_v48 }
 0x160   : > { %878 = shalt.err (!%p875_p7)
}
 0x161   : > { %s879_s20 = scalar_lea.hbm %s1188_s9, 192  ;;  %s883_s12 = scalar_lea.hbm %s1245_s3, 768 }
 0x162   : > { %p880_p1 = scmp.ne.s32.totalorder %s1188_s9, %s879_s20  ;;  %p884_p9 = scmp.lt.u32.totalorder %s1188_s9, %s1245_s3 }
 0x163   : > { %p885_p5 = scmp.lt.u32.totalorder %s883_s12, %s879_s20  ;;  %p887_p6 = scmp.lt.u32.totalorder %s879_s20, %s1188_s9 }
 0x164   : > { %p881_p2 = pnand %p880_p1, %p1102_p11 }
 0x165   : > { %p886_p0 = por %p885_p5, %p884_p9 }
 0x166   : > { %p882_p4 = pneg %p881_p2 }
 0x167   : > { %p888_p8 = por %p887_p6, %p886_p0 }
 0x169   : > { %p889_p10 = pnand %p888_p8, %p882_p4 }
 0x16b   : > { %892 = shalt.err (!%p889_p10)
}
 0x16c   : > { %687 = dma.vmem_to_hbm [thread:$0]  (%p1102_p11), %s1190_s28, 192, %s1188_s9, %s495_s7  }
 0x16d PF: > { %s1271_s26 = sld [smem:[#allocation11_spill]]  ;;  %s1272_s21 = sld [smem:[#allocation12_spill]] }
 0x16e   : > { %p704_p12 = scmp.ge.s32.totalorder %s967_s19, 2 }
 0x173   : > { %s523_s6 = sand.u32 1, %s1271_s26   ;;  %p1273_p13 = scmp.ne.s32.totalorder %s1272_s21, 0 }
 0x174   : > { %s524_s5 = scalar_lea.sflag [#allocation4], %s523_s6 }
 0x175   : > { %p698_p3 = pnand %p704_p12, %p1273_p13 }
 0x177   : > { %934 = dma.done.wait (!%p698_p3), %s524_s5, 192  }
 0x178   : > { %936 = vsyncadd (!%p698_p3), %s524_s5, 4294967104  ;;  %s20_s19 = sadd.s32 1, %s967_s19   ;;  %s1274_s29 = sld [smem:[#allocation13_spill]] }
 0x179   : > { %p17_p7 = scmp.ge.s32.totalorder %s20_s19, 6   ;;  %s1275_s12 = smov %s943_s13 }
 0x17a   : > { %s1276_s13 = smov %s947_s14  ;;  %s1277_s14 = smov %s1119_s27 }
 0x17b   : > { %s1278_s15 = smov %s959_s17  ;;  %s1279_s16 = smov %s963_s18 }
 0x17c   : > { %s1281_s18 = smov %s1287_s4  ;;  %19 = sbr.rel (!%p17_p7) target bundleno = 10 (0xa), region = 81 }
 0x17e   : > { %s1280_s17 = smov %s1274_s29 }
 0x183   :  { %529 = vsyncpa [#allocation3], 1 }
 0x184   :  { %531 = vsyncpa [#allocation3 + $0x1], 1 }
 0x185   :  { %532 = vsyncpa [#allocation6], 1 }
 0x186   :  { %533 = vsyncpa [#allocation4], 1 }
 0x187   :  { %535 = vsyncpa [#allocation4 + $0x1], 1 }

</bundles_post_ra>
